<compile_context>
chip_gen: v7x
topology: tpu7x:2x2x1
jax: 0.10.0
libtpu: 0.0.40
codegen_flags: <defaults>
</compile_context>

<pallas_src>
import functools
import math

import jax
import jax.numpy as jnp
from jax.experimental import pallas as pl
from jax.experimental.pallas import tpu as pltpu

LANE = 128     # TPU lane width: keep last dims multiples of 128 (unmasked stores, full MXU width)
SUBLANE = 8    # sublane granularity for second-to-last block dims


def _round_up(x, m):
    return ((x + m - 1) // m) * m


# ---------------------------------------------------------------------------
# Linear projection kernel: y = x @ W^T + b, tiled over rows of x.
# W stays in PyTorch (out, in) layout; dot_general contracts dim 1 of both
# operands so no transpose is ever materialized (MXU consumes it directly).
# ---------------------------------------------------------------------------
def _linear_kernel(x_ref, w_ref, b_ref, o_ref):
    y = jax.lax.dot_general(
        x_ref[...], w_ref[...],
        dimension_numbers=(((1,), (1,)), ((), ())),
        preferred_element_type=jnp.float32)          # f32 accumulation
    o_ref[...] = (y + b_ref[...]).astype(o_ref.dtype)


def _linear(x, w, b, *, block_rows, out_dtype):
    rows, in_dim = x.shape
    out_p, _ = w.shape
    assert rows % block_rows == 0
    grid = (rows // block_rows,)

    flops = 2 * rows * in_dim * out_p
    bytes_accessed = (x.size * x.dtype.itemsize + w.size * w.dtype.itemsize
                      + b.size * b.dtype.itemsize
                      + rows * out_p * jnp.dtype(out_dtype).itemsize)

    return pl.pallas_call(
        _linear_kernel,
        out_shape=jax.ShapeDtypeStruct((rows, out_p), out_dtype),
        grid_spec=pltpu.PrefetchScalarGridSpec(
            num_scalar_prefetch=0,
            grid=grid,
            in_specs=[
                pl.BlockSpec((block_rows, in_dim), lambda i: (i, 0)),
                pl.BlockSpec((out_p, in_dim), lambda i: (0, 0)),
                pl.BlockSpec((1, out_p), lambda i: (0, 0)),
            ],
            out_specs=pl.BlockSpec((block_rows, out_p), lambda i: (i, 0)),
        ),
        compiler_params=pltpu.CompilerParams(
            dimension_semantics=("parallel",)),
        cost_estimate=pl.CostEstimate(flops=flops, transcendentals=0,
                                      bytes_accessed=bytes_accessed),
    )(x, w, b)


# ---------------------------------------------------------------------------
# Flash-style attention kernel: grid = (q_tiles, kv_tiles); online softmax
# accumulated in f32 VMEM scratch, finalized on the last kv iteration.
# ---------------------------------------------------------------------------
def _flash_attn_kernel(lq_ref, lk_ref, lv_ref, o_ref,
                       m_sc, l_sc, acc_sc,
                       *, post_scale_denom, kv_valid, block_kv, mask_kv):
    j = pl.program_id(1)

    @pl.when(j == 0)
    def _():
        m_sc[...] = jnp.full_like(m_sc, -jnp.inf)
        l_sc[...] = jnp.zeros_like(l_sc)
        acc_sc[...] = jnp.zeros_like(acc_sc)

    # scores (block_q, block_kv): contract hidden dim of both operands directly
    # (no lk.T -> no XLU transpose, no extra VMEM copy); f32 accumulation.
    s = jax.lax.dot_general(
        lq_ref[...], lk_ref[...],
        dimension_numbers=(((1,), (1,)), ((), ())),
        preferred_element_type=jnp.float32)

    if mask_kv:  # static Python bool: only traced when the kv axis is padded
        col = j * block_kv + jax.lax.broadcasted_iota(jnp.int32, s.shape, 1)
        s = jnp.where(col < kv_valid, s, -1e30)

    m_prev = m_sc[...]
    m_new = jnp.maximum(m_prev, jnp.max(s, axis=-1, keepdims=True))
    alpha = jnp.exp(m_prev - m_new)
    p = jnp.exp(s - m_new)                              # f32 softmax math (v5e has no bf16 EUP)
    l_sc[...] = alpha * l_sc[...] + jnp.sum(p, axis=-1, keepdims=True)
    acc_sc[...] = alpha * acc_sc[...] + jnp.dot(
        p.astype(lv_ref.dtype), lv_ref[...], preferred_element_type=jnp.float32)
    m_sc[...] = m_new

    @pl.when(j == pl.num_programs(1) - 1)
    def _():
        # Fold the module's post-softmax 1/sqrt(hidden_dim) into the softmax
        # denominator: out = acc / (l * sqrt(h)).  Approx reciprocal -> EUP slot.
        inv = pl.reciprocal(l_sc[...] * post_scale_denom, approx=True)
        o_ref[...] = (acc_sc[...] * inv).astype(o_ref.dtype)


def _flash_attention(lq, lk, lv, *, hidden_dim, kv_valid, block_q, block_kv,
                     out_dtype=jnp.float32):
    n_p, hp = lq.shape
    m_p, _ = lk.shape
    _, op = lv.shape
    grid = (n_p // block_q, m_p // block_kv)

    kernel = functools.partial(
        _flash_attn_kernel,
        post_scale_denom=math.sqrt(hidden_dim),
        kv_valid=kv_valid,
        block_kv=block_kv,
        mask_kv=(kv_valid != m_p))

    flops = 2 * n_p * m_p * (hp + op)
    bytes_accessed = (lq.size * lq.dtype.itemsize + lk.size * lk.dtype.itemsize
                      + lv.size * lv.dtype.itemsize
                      + n_p * op * jnp.dtype(out_dtype).itemsize)

    return pl.pallas_call(
        kernel,
        out_shape=jax.ShapeDtypeStruct((n_p, op), out_dtype),
        grid_spec=pltpu.PrefetchScalarGridSpec(
            num_scalar_prefetch=0,
            grid=grid,
            in_specs=[
                pl.BlockSpec((block_q, hp), lambda i, j: (i, 0)),   # q tile, fixed over kv axis
                pl.BlockSpec((block_kv, hp), lambda i, j: (j, 0)),  # k tile streams over kv axis
                pl.BlockSpec((block_kv, op), lambda i, j: (j, 0)),  # v tile streams over kv axis
            ],
            out_specs=pl.BlockSpec((block_q, op), lambda i, j: (i, 0)),  # resident accumulator
            scratch_shapes=[
                pltpu.VMEM((block_q, 1), jnp.float32),   # running max m_i
                pltpu.VMEM((block_q, 1), jnp.float32),   # running denom l_i
                pltpu.VMEM((block_q, op), jnp.float32),  # f32 accumulator
            ],
        ),
        compiler_params=pltpu.CompilerParams(
            # q axis shards across TensorCores (v7x megacore); kv axis is the reduction.
            dimension_semantics=("parallel", "arbitrary"),
            vmem_limit_bytes=32 * 1024 * 1024,
        ),
        cost_estimate=pl.CostEstimate(flops=flops, transcendentals=n_p * m_p,
                                      bytes_accessed=bytes_accessed),
    )(lq, lk, lv)


# ---------------------------------------------------------------------------
# Public API
# ---------------------------------------------------------------------------
def prepare_params(params, *, hidden_dim, output_dim, compute_dtype=jnp.bfloat16):
    """One-time padding of PyTorch-layout (out, in) weights/biases.

    Output dims are zero-padded to multiples of 128 (lane-dense MXU / stores);
    the padded columns are exactly zero so results are unchanged.  Weights are
    stored in bf16 for the MXU; biases stay f32 (added after f32 accumulation).
    """
    hp = _round_up(hidden_dim, LANE)
    op = _round_up(output_dim, LANE)

    def pad_w(w, out_p):
        o, _ = w.shape
        return jnp.pad(w, ((0, out_p - o), (0, 0))).astype(compute_dtype)

    def pad_b(b, out_p):
        return jnp.pad(b, (0, out_p - b.shape[0])).reshape(1, out_p).astype(jnp.float32)

    return {
        "wq": pad_w(params["wq"], hp), "bq": pad_b(params["bq"], hp),
        "wk": pad_w(params["wk"], hp), "bk": pad_b(params["bk"], hp),
        "wv": pad_w(params["wv"], op), "bv": pad_b(params["bv"], op),
        "hidden_pad": hp, "output_pad": op,
    }


def qkv_attention(query, key, value, prepared, *, hidden_dim, output_dim,
                  block_q=256, block_kv=256, compute_dtype=jnp.bfloat16):
    """query: (n, d_q), key: (m, d_k), value: (m, d_v) -> (n, output_dim) f32."""
    n, _ = query.shape
    m, _ = key.shape

    # Tile sizes: clamp to the (padded) problem size; keep sublane-aligned.
    block_q = _round_up(min(block_q, _round_up(n, SUBLANE)), SUBLANE)
    block_kv = _round_up(min(block_kv, _round_up(m, SUBLANE)), SUBLANE)

    n_p = _round_up(n, block_q)
    m_p = _round_up(m, block_kv)

    q_p = jnp.pad(query, ((0, n_p - n), (0, 0))).astype(compute_dtype)
    k_p = jnp.pad(key, ((0, m_p - m), (0, 0))).astype(compute_dtype)
    v_p = jnp.pad(value, ((0, m_p - m), (0, 0))).astype(compute_dtype)

    # Hoisted projections: Q/K/V are each projected exactly once (NOT once per
    # q-tile inside the attention loop).  bf16 MXU operands, f32 accumulation.
    lq = _linear(q_p, prepared["wq"], prepared["bq"], block_rows=block_q,
                 out_dtype=compute_dtype)
    lk = _linear(k_p, prepared["wk"], prepared["bk"], block_rows=block_kv,
                 out_dtype=compute_dtype)
    lv = _linear(v_p, prepared["wv"], prepared["bv"], block_rows=block_kv,
                 out_dtype=compute_dtype)

    out_padded = _flash_attention(lq, lk, lv, hidden_dim=hidden_dim, kv_valid=m,
                                  block_q=block_q, block_kv=block_kv,
                                  out_dtype=jnp.float32)

    # TODO(synk): training-mode dropout (stateful PRNG mask) not implemented; eval-mode identity.
    return out_padded[:n, :output_dim]


# ---------------------------------------------------------------------------
# References & test harness
# ---------------------------------------------------------------------------
def _init_linear(key, in_features, out_features):
    """PyTorch-default-style init: U(-1/sqrt(fan_in), +1/sqrt(fan_in))."""
    kw, kb = jax.random.split(key)
    bound = 1.0 / math.sqrt(in_features)
    w = jax.random.uniform(kw, (out_features, in_features), jnp.float32, -bound, bound)
    b = jax.random.uniform(kb, (out_features,), jnp.float32, -bound, bound)
    return w, b


def _reference_f32(query, key, value, params, hidden_dim):
    lq = query @ params["wq"].T + params["bq"]
    lk = key @ params["wk"].T + params["bk"]
    lv = value @ params["wv"].T + params["bv"]
    return (jax.nn.softmax(lq @ lk.T, axis=-1) / math.sqrt(hidden_dim)) @ lv


def _reference_matched(query, key, value, params, hidden_dim, compute_dtype):
    """Reference mimicking the kernel's bf16-operand / f32-accumulate pattern."""
    def lin(x, w, b):
        y = jax.lax.dot_general(x.astype(compute_dtype), w.astype(compute_dtype),
                                dimension_numbers=(((1,), (1,)), ((), ())),
                                preferred_element_type=jnp.float32)
        return (y + b).astype(compute_dtype)
    lq = lin(query, params["wq"], params["bq"])
    lk = lin(key, params["wk"], params["bk"])
    lv = lin(value, params["wv"], params["bv"])
    s = jax.lax.dot_general(lq, lk, dimension_numbers=(((1,), (1,)), ((), ())),
                            preferred_element_type=jnp.float32)
    p = jax.nn.softmax(s, axis=-1)
    out = jnp.dot(p.astype(compute_dtype), lv, preferred_element_type=jnp.float32)
    return out / math.sqrt(hidden_dim)


if __name__ == "__main__":
    # Small shapes consistent with the module's (n, d_q)/(m, d_k)/(m, d_v) contract.
    n, m = 48, 40
    query_dim, key_dim, value_dim = 16, 24, 20
    hidden_dim, output_dim = 32, 48
    dropout_rate = 0.1  # eval-mode identity

    root = jax.random.PRNGKey(0)
    k_q, k_k, k_v, k_wq, k_wk, k_wv = jax.random.split(root, 6)

    input_query = jax.random.normal(k_q, (n, query_dim), jnp.float32)
    input_key = jax.random.normal(k_k, (m, key_dim), jnp.float32)
    input_value = jax.random.normal(k_v, (m, value_dim), jnp.float32)

    wq, bq = _init_linear(k_wq, query_dim, hidden_dim)
    wk, bk = _init_linear(k_wk, key_dim, hidden_dim)
    wv, bv = _init_linear(k_wv, value_dim, output_dim)
    params = {"wq": wq, "bq": bq, "wk": wk, "bk": bk, "wv": wv, "bv": bv}

    # Pad / cast weights once (not per call).
    prepared = prepare_params(params, hidden_dim=hidden_dim, output_dim=output_dim,
                              compute_dtype=jnp.bfloat16)

    # Small blocks so the test exercises a real (3 x 3) grid, the online-softmax
    # accumulator, and the padded-kv masking path.
    out = qkv_attention(input_query, input_key, input_value, prepared,
                        hidden_dim=hidden_dim, output_dim=output_dim,
                        block_q=16, block_kv=16)
    out = jax.block_until_ready(out)

    assert out.shape == (n, output_dim)

    ref_matched = _reference_matched(input_query, input_key, input_value, params,
                                     hidden_dim, jnp.bfloat16)
    ref_f32 = _reference_f32(input_query, input_key, input_value, params, hidden_dim)

    assert jnp.allclose(out, ref_matched, atol=1e-2, rtol=1e-1), \
        "mismatch vs bf16-matched reference"
    assert jnp.allclose(out, ref_f32, atol=3e-2, rtol=2e-1), \
        "mismatch vs pure-f32 reference"

    print("KERNEL_OK")
</pallas_src>

<mosaic_0001>
module attributes {stable_mosaic.version = 11 : i64} {
  func.func @_linear_kernel(%arg0: i32, %arg1: memref<16x16xbf16, #tpu.memory_space<vmem>>, %arg2: memref<128x16xbf16, #tpu.memory_space<vmem>>, %arg3: memref<1x128xf32, #tpu.memory_space<vmem>>, %arg4: memref<16x128xbf16, #tpu.memory_space<vmem>>) attributes {dimension_semantics = [#tpu.dimension_semantics<parallel>], iteration_bounds = array<i64: 3>, scalar_prefetch = 0 : i64, scratch_operands = 0 : i64, tpu.core_type = #tpu.core_type<tc>, window_params = [{transform_indices = @transform_0, window_bounds = array<i64: 16, 16>}, {pipeline_mode = #tpu.pipeline_mode<synchronous>, transform_indices = @transform_1, window_bounds = array<i64: 128, 16>}, {pipeline_mode = #tpu.pipeline_mode<synchronous>, transform_indices = @transform_2, window_bounds = array<i64: 1, 128>}, {transform_indices = @transform_3, window_bounds = array<i64: 16, 128>}]} {
    %c0 = arith.constant 0 : index
    %c0_0 = arith.constant 0 : index
    %0 = vector.load %arg1[%c0, %c0_0] : memref<16x16xbf16, #tpu.memory_space<vmem>>, vector<16x16xbf16>
    %c0_1 = arith.constant 0 : index
    %c0_2 = arith.constant 0 : index
    %1 = vector.load %arg2[%c0_1, %c0_2] : memref<128x16xbf16, #tpu.memory_space<vmem>>, vector<128x16xbf16>
    %cst = arith.constant dense<0.000000e+00> : vector<16x128xf32>
    %2 = tpu.matmul %0, %1, %cst {dimension_numbers = #tpu.dot_dimension_numbers<[1], [1], [0], [0], [0, 0, 1, 0], [], []>} : vector<16x16xbf16>, vector<128x16xbf16>, vector<16x128xf32> -> vector<16x128xf32>
    %c0_3 = arith.constant 0 : index
    %c0_4 = arith.constant 0 : index
    %3 = vector.load %arg3[%c0_3, %c0_4] : memref<1x128xf32, #tpu.memory_space<vmem>>, vector<1x128xf32>
    %4 = vector.broadcast %3 : vector<1x128xf32> to vector<16x128xf32>
    %5 = arith.addf %2, %4 : vector<16x128xf32>
    %6 = arith.truncf %5 : vector<16x128xf32> to vector<16x128xbf16>
    %c0_5 = arith.constant 0 : index
    %c0_6 = arith.constant 0 : index
    %7 = vector.load %arg4[%c0_5, %c0_6] : memref<16x128xbf16, #tpu.memory_space<vmem>>, vector<16x128xbf16>
    tpu.vector_store %arg4[%c0_5, %c0_6], %6 {strides = array<i32>} : memref<16x128xbf16, #tpu.memory_space<vmem>>, vector<16x128xbf16>,
    return
  }
  func.func @transform_0(%arg0: i32) -> (i32, i32) {
    %c0_i32 = arith.constant 0 : i32
    %c0_i32_0 = arith.constant 0 : i32
    return %arg0, %c0_i32 : i32, i32
  }
  func.func @transform_1(%arg0: i32) -> (i32, i32) {
    %c0_i32 = arith.constant 0 : i32
    %c0_i32_0 = arith.constant 0 : i32
    %c0_i32_1 = arith.constant 0 : i32
    return %c0_i32, %c0_i32_0 : i32, i32
  }
  func.func @transform_2(%arg0: i32) -> (i32, i32) {
    %c0_i32 = arith.constant 0 : i32
    %c0_i32_0 = arith.constant 0 : i32
    %c0_i32_1 = arith.constant 0 : i32
    return %c0_i32, %c0_i32_0 : i32, i32
  }
  func.func @transform_3(%arg0: i32) -> (i32, i32) {
    %c0_i32 = arith.constant 0 : i32
    %c0_i32_0 = arith.constant 0 : i32
    return %arg0, %c0_i32 : i32, i32
  }
}

</mosaic_0001>

<bundles_post_ra>
// kernel: tpu_custom_call.1
= control target key start
LH: loop header
LB: loop body
LE: loop exit
PB: predicated region body
PF: predicated region fallthrough
CT: control target
= control target key end

     0   :  { %8 = vsyncpa [#allocation3], 0  ;;  %s739_s0 = inlined_call_operand.vmem [shape: bf16[48,16], index: 0, kind: input, shape index: {}]   ;;  %s740_s1 = inlined_call_operand.vmem [shape: bf16[128,16], index: 1, kind: input, shape index: {}]   ;;  %s741_s2 = inlined_call_operand.vmem [shape: f32[1,128], index: 2, kind: input, shape index: {}]   ;;  %s742_s3 = inlined_call_operand.hbm [shape: bf16[48,128], index: 3, kind: output, shape index: {}]  }
   0x1   :  { %10 = vsyncpa [#allocation3 + $0x1], 0  ;;  %s601_s12 = smov 0   ;;  %s603_s13 = smov 0  }
   0x2   :  { %s605_s14 = smov 0   ;;  %s607_s15 = smov 0  }
   0x3 LB: > { %s622_s16 = sadd.s32 4294967295, %s574_s15   ;;  %s398_s17 = sadd.s32 4294967294, %s574_s15   ;;  %s574_s15 = sphi %s607_s15, %s748_s15   ;;  %s570_s14 = sphi %s605_s14, %s747_s14   ;;  %s566_s13 = sphi %s603_s13, %s746_s13   ;;  %s562_s12 = sphi %s601_s12, %s745_s12  }
   0x4   : > { %s626_s18 = sadd.s32 1, %s574_s15   ;;  %s91_s19 = sadd.s32 1, %s570_s14 }
   0x5   : > { %s88_s20 = ssub.s32 %s574_s15, %s626_s18  ;;  %p101_p0 = scmp.ne.s32.totalorder %s570_s14, %s566_s13 }
   0x6   : > { %p89_p1 = scmp.eq.s32.totalorder %s88_s20, 0  ;;  %p102_p2 = scmp.eq.s32.totalorder %s622_s16, 2 }
   0x7   : > { %p107_p3 = scmp.ne.s32.totalorder %s566_s13, %s562_s12  ;;  %p108_p4 = scmp.eq.s32.totalorder %s398_s17, 2 }
   0x8   : > { %s637_s21 = scalar_select %p89_p1, %s570_s14, %s91_s19  }
   0x9   : > { %p639_p5 = por %p102_p2, %p101_p0  ;;  %p643_p6 = por %p108_p4, %p107_p3 }
   0xa   : > { %p401_p7 = scmp.ge.s32.totalorder %s574_s15, 1  ;;  %p141_p8 = scmp.lt.s32.totalorder %s574_s15, 4 }
   0xc   : > { %p142_p9 = pnand %p401_p7, %p141_p8 }
   0xd   : > { %v503_v0 = vld [vmem:[%s740_s1] sm:$0xff] (!%p142_p9)   ;;  %v576_v1 = vmov (!%p142_p9), 0.0   ;;  %vm243_vm0 = vcmask (!%p142_p9), 130048   ;;  %v504_v3 = vld [vmem:[%s740_s1 + $0x8] sm:$0xff] (!%p142_p9)   ;;  %s403_s28 = sshll.u32 (!%p142_p9), %s622_s16, 1  ;;  %vm577_vm1 = vmmov (!%p142_p9), 0  }
   0xe   : > { %145 = sbr.rel (%p142_p9) target bundleno = 311 (0x137), region = 32  ;;  %440 = vmatprep.subr.bf16.mxu0 (!%p142_p9), %v576_v1  ;;  %v248_v2 = vsel (!%p142_p9), %vm243_vm0, %v503_v0, 0  ;;  %v251_v4 = vsel (!%p142_p9), %vm243_vm0, %v504_v3, 0  ;;  %456 = vmatprep.mubr.msk.bf16.mxu0 (!%p142_p9), %vm577_vm1, %v576_v1  ;;  %p166_p10 = scmp.lt.s32.totalorder (!%p142_p9), %s403_s28, 5  ;;  %v505_v5 = vld [vmem:[%s740_s1 + $0x10] sm:$0xff] (!%p142_p9)   ;;  %v506_v7 = vld [vmem:[%s740_s1 + $0x18] sm:$0xff] (!%p142_p9)  }
   0xf   : > { %441 = vmatpush3.bf16.xpose.msra.mxu0 (!%p142_p9), %v248_v2  ;;  %v254_v6 = vsel (!%p142_p9), %vm243_vm0, %v505_v5, 0  ;;  %v257_v8 = vsel (!%p142_p9), %vm243_vm0, %v506_v7, 0  ;;  %v507_v9 = vld [vmem:[%s740_s1 + $0x20] sm:$0xff] (!%p142_p9)   ;;  %v508_v11 = vld [vmem:[%s740_s1 + $0x28] sm:$0xff] (!%p142_p9)   ;;  %v509_v13 = vld [vmem:[%s740_s1 + $0x30] sm:$0xff] (!%p142_p9)   ;;  %s162_s27 = sand.u32 (!%p142_p9), 1, %s566_s13  }
  0x10   : > { %442 = vmatprep.subr.bf16.mxu0 (!%p142_p9), %v576_v1  ;;  %v260_v10 = vsel (!%p142_p9), %vm243_vm0, %v507_v9, 0  ;;  %v263_v12 = vsel (!%p142_p9), %vm243_vm0, %v508_v11, 0  ;;  %v266_v14 = vsel (!%p142_p9), %vm243_vm0, %v509_v13, 0  ;;  %v510_v15 = vld [vmem:[%s740_s1 + $0x38] sm:$0xff] (!%p142_p9)   ;;  %v405_v18 = vld [vmem:[%s741_s2] ss:$0 sm:$0xff] (!%p142_p9) }
  0x11   : > { %v269_v16 = vsel (!%p142_p9), %vm243_vm0, %v510_v15, 0  ;;  %s425_s6 = sshll.u32 (!%p142_p9), %s622_s16, 7  ;;  %s698_s10 = scalar_lea.sflag (!%p142_p9), [#allocation3], %s162_s27 }
  0x12   : > { %s696_s9 = scalar_lea.hbm (!%p142_p9), %s742_s3, %s425_s6  ;;  %s578_s16 = smov (!%p142_p9), [#allocation2]  }
  0x13   : > { %s516_s17 = sshll.u32 (!%p142_p9), %s578_s16, 4  ;;  %s517_s17 = int_to_ptr.vmem [resolvable:$false] %s516_s17 }
  0x14   : > { %s518_s19 = scalar_lea.vmem (!%p142_p9), %s517_s17, 256 }
  0x15   : > { %s750_s28 = smov (!%p166_p10, %s403_s28), 5 }
  0x16   : > { %s404_s4 = sshll.u32 %s750_s28, 2  ;;  %s402_s28 = sshll.u32 %s162_s27, 3 }
  0x17   : > { %443 = vmatpush3.bf16.xpose.msra.mxu0 %v251_v4  ;;  %s169_s7 = scalar_lea.vmem %s739_s0, %s404_s4  ;;  %s164_s4 = scalar_lea.vmem [#allocation2], %s402_s28 }
  0x18   : > { %444 = vmatprep.subr.bf16.mxu0 %v576_v1  ;;  %v511_v17 = vld [vmem:[%s169_s7] sm:$0xff]   ;;  %s336_s5 = sshll.u32 %s164_s4, 4  ;;  %s691_s5 = int_to_ptr.vmem [resolvable:$true] %s336_s5 }
  0x19   : > { %s512_s11 = scalar_lea.vmem %s691_s5, 128  ;;  %p519_p0 = scmp.lt.s32.totalorder %s691_s5, %s517_s17 }
  0x1a   : > { %p513_p11 = scmp.ne.s32.totalorder %s691_s5, %s512_s11  ;;  %p520_p1 = scmp.lt.s32.totalorder %s518_s19, %s512_s11 }
  0x1c   : > { %p514_p12 = pnand %p513_p11, %p639_p5  ;;  %p521_p2 = por %p520_p1, %p519_p0 }
  0x1e   : > { %p515_p13 = pneg %p514_p12 }
  0x1f   : > { %445 = vmatpush3.bf16.xpose.msra.mxu0 %v254_v6 }
  0x20   : > { %446 = vmatprep.subr.bf16.mxu0 %v576_v1  ;;  %p522_p3 = pnand %p521_p2, %p515_p13 }
  0x27   : > { %447 = vmatpush3.bf16.xpose.msra.mxu0 %v257_v8 }
  0x28   : > { %448 = vmatprep.subr.bf16.mxu0 %v576_v1 }
  0x2f   : > { %449 = vmatpush3.bf16.xpose.msra.mxu0 %v260_v10 }
  0x30   : > { %450 = vmatprep.subr.bf16.mxu0 %v576_v1 }
  0x37   : > { %451 = vmatpush3.bf16.xpose.msra.mxu0 %v263_v12 }
  0x38   : > { %452 = vmatprep.subr.bf16.mxu0 %v576_v1 }
  0x3f   : > { %453 = vmatpush3.bf16.xpose.msra.mxu0 %v266_v14 }
  0x40   : > { %454 = vmatprep.subr.bf16.mxu0 %v576_v1 }
  0x47   : > { %455 = vmatpush3.bf16.xpose.msra.mxu0 %v269_v16 }
  0x4e   : > { %457 = vmatmul.mubr.msk.bf16.vlgmr.msra.gmra.mrb[0].mxu0 %vm243_vm0, %v511_v17 }
 0x121   : > { %v305_v19 = vpop.f32.mrb[0].mxu0 }
 0x122   : > { %v458_v20 = vpop.f32.mrb[1].mxu0  ;;  %v306_v22 = vadd.f32 %v405_v18, %v305_v19 }
 0x123   : > { %v308_v21 = vpop.f32.mrb[2].mxu0 }
 0x124   : > { %v309_v23 = vadd.f32 %v405_v18, %v308_v21  ;;  %v459_v24 = vpop.f32.mrb[3].mxu0 }
 0x126   : > { %v429_v25 = vpack.c.bf16 %v309_v23, %v306_v22 }
 0x128   : > { %430 = vst [vmem:[%s164_s4] sm:$0xff] %v429_v25  }
 0x129   : > { %525 = shalt.err (!%p522_p3)
}
 0x12a   : > { %s526_s20 = scalar_lea.hbm %s696_s9, 128  ;;  %s530_s26 = scalar_lea.hbm %s742_s3, 384 }
 0x12b   : > { %p527_p4 = scmp.ne.s32.totalorder %s696_s9, %s526_s20  ;;  %p531_p9 = scmp.lt.u32.totalorder %s696_s9, %s742_s3 }
 0x12c   : > { %p532_p10 = scmp.lt.u32.totalorder %s530_s26, %s526_s20  ;;  %p534_p12 = scmp.lt.u32.totalorder %s526_s20, %s696_s9 }
 0x12d   : > { %p528_p7 = pnand %p527_p4, %p639_p5 }
 0x12e   : > { %p533_p11 = por %p532_p10, %p531_p9 }
 0x12f   : > { %p529_p8 = pneg %p528_p7 }
 0x130   : > { %p535_p13 = por %p534_p12, %p533_p11 }
 0x132   : > { %p536_p0 = pnand %p535_p13, %p529_p8 }
 0x134   : > { %539 = shalt.err (!%p536_p0)
}
 0x135   : > { %s579_s29 = smov 64   ;;  %s580_s30 = smov 4  }
 0x136   : > { %460 = dma.vmem_to_hbm [thread:$0]  (%p639_p5), %s691_s5, 128, %s696_s9, %s698_s10, %s579_s29, %s579_s29, %s580_s30  }
 0x137 PF: > { %p466_p1 = scmp.ge.s32.totalorder %s574_s15, 2  ;;  %s351_s4 = sand.u32 1, %s562_s12  }
 0x138   : > { %s352_s6 = scalar_lea.sflag [#allocation3], %s351_s4 }
 0x139   : > { %p463_p2 = pnand %p466_p1, %p643_p6 }
 0x13b   : > { %557 = dma.done.wait (!%p463_p2), %s352_s6, 128  }
 0x13c   : > { %559 = vsyncadd (!%p463_p2), %s352_s6, 4294967168  ;;  %p13_p3 = scmp.ge.s32.totalorder %s626_s18, 5   ;;  %s745_s12 = smov %s566_s13 }
 0x13d   : > { %s746_s13 = smov %s570_s14  ;;  %s747_s14 = smov %s637_s21 }
 0x13e   : > { %s748_s15 = smov %s626_s18  ;;  %15 = sbr.rel (!%p13_p3) target bundleno = 3 (0x3), region = 67 }
 0x145   :  { %357 = vsyncpa [#allocation3], 1 }
 0x146   :  { %359 = vsyncpa [#allocation3 + $0x1], 1 }

</bundles_post_ra>
